<compile_context>
chip_gen: v6e
topology: v6e:2x2x1
jax: 0.10.0
libtpu: 0.0.40
codegen_flags: <defaults>
</compile_context>

<pallas_src>
import functools

import jax
import jax.numpy as jnp
from jax.experimental import pallas as pl
from jax.experimental.pallas import tpu as pltpu


LANE = 128                             # lane width: pad all feature dims to a multiple
NODE_PAD = 256                         # pad node count to a multiple of this
VMEM_LIMIT = 40 * 1024 * 1024          # safe on v7x (64 MiB physical / TC), ample on v5e/v6e
VMEM_BUDGET = 32 * 1024 * 1024         # target working-set bound used by the tile planner
RESIDENT_BYTES_MAX = 8 * 1024 * 1024   # whole-operand VMEM residency threshold (x2 buffers)


# ----------------------------- Pallas kernels --------------------------------

def _gcn_agg_post_kernel(a_ref, x_ref, w_ref, b_ref, o_ref, acc_ref,
                         *, apply_relu, tk, resident):
    """out[i] = relu?( (sum_k A[i,k] @ X[k]) @ W + b ).   Grid = (num_m, num_k)."""
    k = pl.program_id(1)

    @pl.when(k == 0)
    def _init():
        acc_ref[...] = jnp.zeros_like(acc_ref)

    if resident:
        start = pl.multiple_of(k * tk, tk)
        x_blk = x_ref[pl.ds(start, tk), :]       # X fully VMEM-resident, fetched once
    else:
        x_blk = x_ref[...]
    # bf16 MXU operands, f32 accumulation.
    acc_ref[...] += jnp.dot(a_ref[...], x_blk, preferred_element_type=jnp.float32)

    @pl.when(k == pl.num_programs(1) - 1)
    def _finalize():
        out = jnp.dot(acc_ref[...].astype(jnp.bfloat16), w_ref[...],
                      preferred_element_type=jnp.float32)
        out = out + b_ref[...]                   # epilogue kept in f32 (v5e-friendly)
        if apply_relu:
            out = jnp.maximum(out, 0.0)
        o_ref[...] = out.astype(o_ref.dtype)


def _gcn_agg_pre_kernel(a_ref, h_ref, b_ref, o_ref, acc_ref,
                        *, apply_relu, tk, resident):
    """out[i] = relu?( (sum_k A[i,k] @ H[k]) + b ) with H = X @ W precomputed."""
    k = pl.program_id(1)

    @pl.when(k == 0)
    def _init():
        acc_ref[...] = jnp.zeros_like(acc_ref)

    if resident:
        start = pl.multiple_of(k * tk, tk)
        h_blk = h_ref[pl.ds(start, tk), :]       # H fully VMEM-resident, fetched once
    else:
        h_blk = h_ref[...]
    acc_ref[...] += jnp.dot(a_ref[...], h_blk, preferred_element_type=jnp.float32)

    @pl.when(k == pl.num_programs(1) - 1)
    def _finalize():
        out = acc_ref[...] + b_ref[...]
        if apply_relu:
            out = jnp.maximum(out, 0.0)
        o_ref[...] = out.astype(o_ref.dtype)


def _project_kernel(x_ref, w_ref, o_ref):
    """H = X @ W (row-tiled), used for the A @ (X @ W) re-association."""
    o_ref[...] = jnp.dot(x_ref[...], w_ref[...],
                         preferred_element_type=jnp.float32).astype(o_ref.dtype)


# ----------------------------- tile planning ----------------------------------

def _plan_layer(n, feat_dim, out_width, out_bytes):
    """Pick (tm, tk, resident) for the aggregation call.

    n is the padded node count (multiple of NODE_PAD); feat_dim is the width of the
    operand aggregated by A (doutp in the pre path, dinp in the post path).
    Keeps >= 2 row tiles so the v7x megacore split on the 'parallel' axis has work,
    and keeps the double/triple-buffered working set under VMEM_BUDGET (v7x-safe).
    """
    tm = 128 if n <= 256 else 256
    tk = next((c for c in (2048, 1024, 512) if n % c == 0), 256)
    resident = n * feat_dim * 2 <= RESIDENT_BYTES_MAX

    def vmem_bytes(tk_, res_):
        a = 3 * tm * tk_ * 2                                   # A stream, up to 3 buffers
        f = 2 * (n if res_ else tk_) * feat_dim * 2            # H/X operand
        acc = tm * feat_dim * 4                                # f32 accumulator
        out = 2 * tm * out_width * out_bytes                   # output tiles
        wb = 2 * (feat_dim * out_width * 2 + out_width * 4)    # W + bias upper bound
        return a + f + acc + out + wb

    while tk > 256 and vmem_bytes(tk, resident) > VMEM_BUDGET:
        tk //= 2
    if vmem_bytes(tk, resident) > VMEM_BUDGET:
        resident = False
    return tm, tk, resident


def _a_block_spec(tm, tk, num_k):
    # Deeper buffering on the hot A stream only when the reduction loop is long
    # enough to benefit (also keeps the tiny-demo path on the default pipeline).
    if num_k >= 3:
        return pl.BlockSpec((tm, tk), lambda i, k: (i, k), pipeline_mode=pl.Buffered(3))
    return pl.BlockSpec((tm, tk), lambda i, k: (i, k))


# ----------------------------- wrappers ---------------------------------------

def project_pallas(x, w, *, tm):
    n, dinp = x.shape
    doutp = w.shape[1]
    return pl.pallas_call(
        _project_kernel,
        out_shape=jax.ShapeDtypeStruct((n, doutp), jnp.bfloat16),
        grid_spec=pltpu.PrefetchScalarGridSpec(
            num_scalar_prefetch=0,
            grid=(n // tm,),
            in_specs=[pl.BlockSpec((tm, dinp), lambda i: (i, 0)),
                      pl.BlockSpec((dinp, doutp), lambda i: (0, 0))],
            out_specs=pl.BlockSpec((tm, doutp), lambda i: (i, 0))),
        compiler_params=pltpu.CompilerParams(
            dimension_semantics=("parallel",),
            vmem_limit_bytes=VMEM_LIMIT),
        cost_estimate=pl.CostEstimate(
            flops=2 * n * dinp * doutp,
            transcendentals=0,
            bytes_accessed=2 * (n * dinp + dinp * doutp + n * doutp)),
    )(x, w)


def gcn_layer_pallas(a, x, w, b, *, apply_relu, out_dtype):
    """One GCNConv layer (optionally fused with ReLU).

    a: (Np, Np) bf16 normalized adjacency (padded); x: (Np, Dinp) bf16 (padded);
    w: (Dinp, Doutp) bf16; b: (1, Doutp) f32.  All padded dims are multiples of 128.
    """
    n = a.shape[0]
    dinp = x.shape[1]
    doutp = w.shape[1]
    out_bytes = jnp.dtype(out_dtype).itemsize
    sem = ("parallel", "arbitrary")   # row tiles shard across TCs (v7x); K is the reduction

    if doutp <= dinp:
        # Re-associate: A @ (X @ W) -- the big N x N matmul runs on the narrower width.
        tm, tk, resident = _plan_layer(n, doutp, doutp, out_bytes)
        grid = (n // tm, n // tk)
        h = project_pallas(x, w, tm=tm)
        if resident:
            h_spec = pl.BlockSpec((n, doutp), lambda i, k: (0, 0))   # fetched once
            h_bytes = 2 * n * doutp
        else:
            h_spec = pl.BlockSpec((tk, doutp), lambda i, k: (k, 0))
            h_bytes = 2 * grid[0] * n * doutp
        kern = functools.partial(_gcn_agg_pre_kernel, apply_relu=apply_relu,
                                 tk=tk, resident=resident)
        return pl.pallas_call(
            kern,
            out_shape=jax.ShapeDtypeStruct((n, doutp), out_dtype),
            grid_spec=pltpu.PrefetchScalarGridSpec(
                num_scalar_prefetch=0,
                grid=grid,
                in_specs=[_a_block_spec(tm, tk, grid[1]),
                          h_spec,
                          pl.BlockSpec((1, doutp), lambda i, k: (0, 0))],
                out_specs=pl.BlockSpec((tm, doutp), lambda i, k: (i, 0)),
                scratch_shapes=[pltpu.VMEM((tm, doutp), jnp.float32)]),
            compiler_params=pltpu.CompilerParams(
                dimension_semantics=sem, vmem_limit_bytes=VMEM_LIMIT),
            cost_estimate=pl.CostEstimate(
                flops=2 * n * n * doutp,
                transcendentals=0,
                bytes_accessed=2 * n * n + h_bytes + 4 * doutp
                               + out_bytes * n * doutp),
        )(a, h, b)

    # Post path: acc = A @ X, then acc @ W in the finalize.
    tm, tk, resident = _plan_layer(n, dinp, doutp, out_bytes)
    grid = (n // tm, n // tk)
    if resident:
        x_spec = pl.BlockSpec((n, dinp), lambda i, k: (0, 0))        # fetched once
        x_bytes = 2 * n * dinp
    else:
        x_spec = pl.BlockSpec((tk, dinp), lambda i, k: (k, 0))
        x_bytes = 2 * grid[0] * n * dinp
    kern = functools.partial(_gcn_agg_post_kernel, apply_relu=apply_relu,
                             tk=tk, resident=resident)
    return pl.pallas_call(
        kern,
        out_shape=jax.ShapeDtypeStruct((n, doutp), out_dtype),
        grid_spec=pltpu.PrefetchScalarGridSpec(
            num_scalar_prefetch=0,
            grid=grid,
            in_specs=[_a_block_spec(tm, tk, grid[1]),
                      x_spec,
                      pl.BlockSpec((dinp, doutp), lambda i, k: (0, 0)),
                      pl.BlockSpec((1, doutp), lambda i, k: (0, 0))],
            out_specs=pl.BlockSpec((tm, doutp), lambda i, k: (i, 0)),
            scratch_shapes=[pltpu.VMEM((tm, dinp), jnp.float32)]),
        compiler_params=pltpu.CompilerParams(
            dimension_semantics=sem, vmem_limit_bytes=VMEM_LIMIT),
        cost_estimate=pl.CostEstimate(
            flops=2 * n * n * dinp + 2 * n * dinp * doutp,
            transcendentals=0,
            bytes_accessed=2 * n * n + x_bytes + 2 * dinp * doutp + 4 * doutp
                           + out_bytes * n * doutp),
    )(a, x, w, b)


# ----------------------------- model (glue) -----------------------------------

def _round_up(x, m):
    return ((x + m - 1) // m) * m


def _pad2(x, rows, cols):
    r, c = x.shape
    return jnp.pad(x, ((0, rows - r), (0, cols - c)))


def init_gcn_params(key, input_dim, hidden_dim, output_dim, nb_layers):
    """Deterministic synthetic parameters matching GCN.__init__ layer shapes."""
    if nb_layers > 1:
        dims = [(input_dim, hidden_dim)]
        dims += [(hidden_dim, hidden_dim)] * (nb_layers - 2)
        dims += [(hidden_dim, output_dim)]
    else:
        dims = [(input_dim, output_dim)]

    params = []
    for (din, dout) in dims:
        key, k1, k2 = jax.random.split(key, 3)
        scale = 1.0 / jnp.sqrt(jnp.float32(din))
        w = jax.random.normal(k1, (din, dout), jnp.float32) * scale  # lin.weight^T
        b = jax.random.normal(k2, (1, dout), jnp.float32) * scale    # bias
        params.append((w, b))
    return params


def build_gcn_norm_matrix(edge_index, num_nodes):
    """Dense A_hat = D^{-1/2} (A + I) D^{-1/2} with PyG gcn_norm semantics."""
    src = edge_index[0]
    dst = edge_index[1]
    # add_remaining_self_loops: drop existing self-loops, add a weight-1 loop per node.
    ew = jnp.where(src != dst, 1.0, 0.0).astype(jnp.float32)
    adj = jnp.zeros((num_nodes, num_nodes), jnp.float32).at[dst, src].add(ew)
    adj = adj + jnp.eye(num_nodes, dtype=jnp.float32)
    deg = adj.sum(axis=1)                                  # in-degree incl. self-loop
    dinv = jax.lax.rsqrt(jnp.maximum(deg, 1e-12))
    return adj * dinv[:, None] * dinv[None, :]
    # TODO(synk): for large sparse graphs, replace the dense A_hat with a row-pointer /
    # neighbor-index scalar-prefetch gather kernel (O(E) instead of O(N^2) traffic).


def gcn_forward(params, x, edge_index):
    """Inference-mode forward. Dropout(p=0.5) is the identity in eval mode."""
    n, din = x.shape
    np_ = _round_up(n, NODE_PAD)

    a = build_gcn_norm_matrix(edge_index, n)
    a_p = _pad2(a, np_, np_).astype(jnp.bfloat16)
    h = _pad2(x, np_, _round_up(din, LANE)).astype(jnp.bfloat16)

    num_layers = len(params)
    for i, (w, b) in enumerate(params):
        d_in, d_out = w.shape
        dinp, doutp = _round_up(d_in, LANE), _round_up(d_out, LANE)
        w_p = _pad2(w, dinp, doutp).astype(jnp.bfloat16)
        b_p = _pad2(b, 1, doutp).astype(jnp.float32)
        last = (i == num_layers - 1)
        apply_relu = (num_layers > 1) and (not last)
        out_dtype = jnp.float32 if last else jnp.bfloat16
        h = gcn_layer_pallas(a_p, h, w_p, b_p, apply_relu=apply_relu,
                             out_dtype=out_dtype)
        # TODO(synk): training-mode dropout (p=0.5) not implemented; eval mode -> identity.
    return h[:n, :params[-1][0].shape[1]]


def gcn_reference(params, x, edge_index):
    """Pure-JAX f32 reference (same semantics, no padding / bf16)."""
    a = build_gcn_norm_matrix(edge_index, x.shape[0])
    h = x
    num_layers = len(params)
    for i, (w, b) in enumerate(params):
        h = a @ (h @ w) + b
        if num_layers > 1 and i < num_layers - 1:
            h = jnp.maximum(h, 0.0)
    return h


# ----------------------------- main -------------------------------------------

if __name__ == "__main__":
    INPUT_DIM, HIDDEN_DIM, OUTPUT_DIM, NB_LAYERS = 8, 192, 4, 3
    NUM_NODES, NUM_EDGES = 200, 800   # pads to 256 nodes -> 2 row tiles (megacore-friendly)

    key = jax.random.PRNGKey(0)
    k_x, k_src, k_dst, k_params = jax.random.split(key, 4)

    x = jax.random.normal(k_x, (NUM_NODES, INPUT_DIM), jnp.float32)
    src = jax.random.randint(k_src, (NUM_EDGES,), 0, NUM_NODES)
    dst = jax.random.randint(k_dst, (NUM_EDGES,), 0, NUM_NODES)
    edge_index = jnp.stack([src, dst], axis=0)  # [2, E], row 0 = source, row 1 = target

    params = init_gcn_params(k_params, INPUT_DIM, HIDDEN_DIM, OUTPUT_DIM, NB_LAYERS)

    out = gcn_forward(params, x, edge_index)
    out = jax.block_until_ready(out)
    assert out.shape == (NUM_NODES, OUTPUT_DIM)

    # Loose check vs f32 reference (bf16 MXU operands -> small benign differences).
    ref = gcn_reference(params, x, edge_index)
    rel_err = float(jnp.max(jnp.abs(out - ref)) / (jnp.max(jnp.abs(ref)) + 1e-6))
    assert rel_err < 0.1, f"mismatch vs reference: {rel_err}"

    print("KERNEL_OK")
</pallas_src>

<mosaic_0001>
module attributes {stable_mosaic.version = 11 : i64} {
  func.func @_gcn_agg_post_kernel(%arg0: i32, %arg1: i32, %arg2: memref<128x256xbf16, #tpu.memory_space<vmem>>, %arg3: memref<256x128xbf16, #tpu.memory_space<vmem>>, %arg4: memref<128x256xbf16, #tpu.memory_space<vmem>>, %arg5: memref<1x256xf32, #tpu.memory_space<vmem>>, %arg6: memref<128x256xbf16, #tpu.memory_space<vmem>>, %arg7: memref<128x128xf32, #tpu.memory_space<vmem>>) attributes {dimension_semantics = [#tpu.dimension_semantics<parallel>, #tpu.dimension_semantics<arbitrary>], iteration_bounds = array<i64: 2, 1>, scalar_prefetch = 0 : i64, scratch_operands = 1 : i64, tpu.core_type = #tpu.core_type<tc>, window_params = [{transform_indices = @transform_0, window_bounds = array<i64: 128, 256>}, {pipeline_mode = #tpu.pipeline_mode<synchronous>, transform_indices = @transform_1, window_bounds = array<i64: 256, 128>}, {pipeline_mode = #tpu.pipeline_mode<synchronous>, transform_indices = @transform_2, window_bounds = array<i64: 128, 256>}, {pipeline_mode = #tpu.pipeline_mode<synchronous>, transform_indices = @transform_3, window_bounds = array<i64: 1, 256>}, {transform_indices = @transform_4, window_bounds = array<i64: 128, 256>}]} {
    %c0_i32 = arith.constant 0 : i32
    %0 = arith.cmpi eq, %arg1, %c0_i32 : i32
    %1 = arith.extui %0 : i1 to i32
    %c0_i32_0 = arith.constant 0 : i32
    %2 = arith.cmpi ne, %1, %c0_i32_0 : i32
    scf.if %2 {
      %cst_9 = arith.constant 0.000000e+00 : f32
      %15 = vector.broadcast %cst_9 : f32 to vector<128x128xf32>
      %c0_10 = arith.constant 0 : index
      %c0_11 = arith.constant 0 : index
      %16 = vector.load %arg7[%c0_10, %c0_11] : memref<128x128xf32, #tpu.memory_space<vmem>>, vector<128x128xf32>
      tpu.vector_store %arg7[%c0_10, %c0_11], %15 {strides = array<i32>} : memref<128x128xf32, #tpu.memory_space<vmem>>, vector<128x128xf32>,
    } else {
    }
    %c256_i32 = arith.constant 256 : i32
    %3 = arith.muli %arg1, %c256_i32 : i32
    %4 = tpu.assume_multiple %3, 256 : i32
    %5 = arith.index_cast %4 : i32 to index
    %c0 = arith.constant 0 : index
    %6 = vector.load %arg3[%5, %c0] : memref<256x128xbf16, #tpu.memory_space<vmem>>, vector<256x128xbf16>
    %c0_1 = arith.constant 0 : index
    %c0_2 = arith.constant 0 : index
    %7 = vector.load %arg7[%c0_1, %c0_2] : memref<128x128xf32, #tpu.memory_space<vmem>>, vector<128x128xf32>
    %c0_3 = arith.constant 0 : index
    %c0_4 = arith.constant 0 : index
    %8 = vector.load %arg2[%c0_3, %c0_4] : memref<128x256xbf16, #tpu.memory_space<vmem>>, vector<128x256xbf16>
    %cst = arith.constant dense<0.000000e+00> : vector<128x128xf32>
    %9 = tpu.matmul %8, %6, %cst {dimension_numbers = #tpu.dot_dimension_numbers<[1], [0], [0], [1], [0, 0, 1, 1], [], []>} : vector<128x256xbf16>, vector<256x128xbf16>, vector<128x128xf32> -> vector<128x128xf32>
    %10 = arith.addf %7, %9 : vector<128x128xf32>
    %c0_5 = arith.constant 0 : index
    %c0_6 = arith.constant 0 : index
    %11 = vector.load %arg7[%c0_5, %c0_6] : memref<128x128xf32, #tpu.memory_space<vmem>>, vector<128x128xf32>
    tpu.vector_store %arg7[%c0_5, %c0_6], %10 {strides = array<i32>} : memref<128x128xf32, #tpu.memory_space<vmem>>, vector<128x128xf32>,
    %c0_i32_7 = arith.constant 0 : i32
    %12 = arith.cmpi eq, %arg1, %c0_i32_7 : i32
    %13 = arith.extui %12 : i1 to i32
    %c0_i32_8 = arith.constant 0 : i32
    %14 = arith.cmpi ne, %13, %c0_i32_8 : i32
    scf.if %14 {
      %c0_9 = arith.constant 0 : index
      %c0_10 = arith.constant 0 : index
      %15 = vector.load %arg7[%c0_9, %c0_10] : memref<128x128xf32, #tpu.memory_space<vmem>>, vector<128x128xf32>
      %16 = arith.truncf %15 : vector<128x128xf32> to vector<128x128xbf16>
      %c0_11 = arith.constant 0 : index
      %c0_12 = arith.constant 0 : index
      %17 = vector.load %arg4[%c0_11, %c0_12] : memref<128x256xbf16, #tpu.memory_space<vmem>>, vector<128x256xbf16>
      %cst_13 = arith.constant dense<0.000000e+00> : vector<128x256xf32>
      %18 = tpu.matmul %16, %17, %cst_13 {dimension_numbers = #tpu.dot_dimension_numbers<[1], [0], [0], [1], [0, 0, 1, 1], [], []>} : vector<128x128xbf16>, vector<128x256xbf16>, vector<128x256xf32> -> vector<128x256xf32>
      %c0_14 = arith.constant 0 : index
      %c0_15 = arith.constant 0 : index
      %19 = vector.load %arg5[%c0_14, %c0_15] : memref<1x256xf32, #tpu.memory_space<vmem>>, vector<1x256xf32>
      %20 = vector.broadcast %19 : vector<1x256xf32> to vector<128x256xf32>
      %21 = arith.addf %18, %20 : vector<128x256xf32>
      %cst_16 = arith.constant 0.000000e+00 : f32
      %22 = vector.broadcast %cst_16 : f32 to vector<128x256xf32>
      %23 = arith.maximumf %21, %22 : vector<128x256xf32>
      %24 = arith.truncf %23 : vector<128x256xf32> to vector<128x256xbf16>
      %c0_17 = arith.constant 0 : index
      %c0_18 = arith.constant 0 : index
      %25 = vector.load %arg6[%c0_17, %c0_18] : memref<128x256xbf16, #tpu.memory_space<vmem>>, vector<128x256xbf16>
      tpu.vector_store %arg6[%c0_17, %c0_18], %24 {strides = array<i32>} : memref<128x256xbf16, #tpu.memory_space<vmem>>, vector<128x256xbf16>,
    } else {
    }
    return
  }
  func.func @transform_0(%arg0: i32, %arg1: i32) -> (i32, i32) {
    %c0_i32 = arith.constant 0 : i32
    return %arg0, %arg1 : i32, i32
  }
  func.func @transform_1(%arg0: i32, %arg1: i32) -> (i32, i32) {
    %c0_i32 = arith.constant 0 : i32
    %c0_i32_0 = arith.constant 0 : i32
    %c0_i32_1 = arith.constant 0 : i32
    return %c0_i32, %c0_i32_0 : i32, i32
  }
  func.func @transform_2(%arg0: i32, %arg1: i32) -> (i32, i32) {
    %c0_i32 = arith.constant 0 : i32
    %c0_i32_0 = arith.constant 0 : i32
    %c0_i32_1 = arith.constant 0 : i32
    return %c0_i32, %c0_i32_0 : i32, i32
  }
  func.func @transform_3(%arg0: i32, %arg1: i32) -> (i32, i32) {
    %c0_i32 = arith.constant 0 : i32
    %c0_i32_0 = arith.constant 0 : i32
    %c0_i32_1 = arith.constant 0 : i32
    return %c0_i32, %c0_i32_0 : i32, i32
  }
  func.func @transform_4(%arg0: i32, %arg1: i32) -> (i32, i32) {
    %c0_i32 = arith.constant 0 : i32
    %c0_i32_0 = arith.constant 0 : i32
    return %arg0, %c0_i32 : i32, i32
  }
}

</mosaic_0001>

<bundles_post_ra>
// kernel: tpu_custom_call.1
= control target key start
LH: loop header
LB: loop body
LE: loop exit
PB: predicated region body
PF: predicated region fallthrough
CT: control target
= control target key end

     0   :  { %9 = vsyncpa [#allocation4], 0  ;;  %s1979_s0 = inlined_call_operand.hbm [shape: bf16[256,256], index: 0, kind: input, shape index: {}]   ;;  %s1980_s1 = inlined_call_operand.hbm [shape: bf16[256,128], index: 1, kind: input, shape index: {}]   ;;  %s1981_s2 = inlined_call_operand.hbm [shape: bf16[128,256], index: 2, kind: input, shape index: {}]   ;;  %s1982_s3 = inlined_call_operand.vmem [shape: f32[1,256], index: 3, kind: input, shape index: {}]   ;;  %s1983_s4 = inlined_call_operand.hbm [shape: bf16[256,256], index: 4, kind: output, shape index: {}]  }
   0x1   :  { %11 = vsyncpa [#allocation4 + $0x1], 0 }
   0x2   :  { %12 = vsyncpa [#allocation7], 0 }
   0x3   :  { %13 = vsyncpa [#allocation5], 0 }
   0x4   :  { %15 = vsyncpa [#allocation5 + $0x1], 0  ;;  %s1697_s15 = smov 0   ;;  %s1699_s16 = smov 0  }
   0x5   :  { %s1701_s17 = smov 0   ;;  %s1703_s18 = smov 0  }
   0x6   :  { %s1705_s19 = smov 0   ;;  %s1707_s20 = smov 0  }
   0x7 LB: > { %s1172_s21 = sadd.s32 4294967295, %s1659_s20   ;;  %s1173_s22 = sadd.s32 4294967294, %s1659_s20   ;;  %s1659_s20 = sphi %s1707_s20, %s21_s20   ;;  %s1655_s19 = sphi %s1705_s19, %s2007_s19   ;;  %s1651_s18 = sphi %s1703_s18, %s2006_s18   ;;  %s1647_s17 = sphi %s1701_s17, %s2005_s17   ;;  %s1643_s16 = sphi %s1699_s16, %s2004_s16   ;;  %s1639_s15 = sphi %s1697_s15, %s2003_s15  }
   0x8   : > { %p55_p0 = scmp.ne.s32.totalorder %s1643_s16, %s1639_s15  ;;  %p1731_p1 = scmp.eq.s32.totalorder %s1172_s21, 0 }
   0x9   : > { %p1735_p2 = scmp.eq.s32.totalorder %s1172_s21, 1  ;;  %p148_p3 = scmp.eq.s32.totalorder %s1173_s22, 1 }
   0xa   : > { %s1989_s23 = scalar_select %p1731_p1, 1, 0 }
   0xb   : > { %p1741_p4 = por %p1731_p1, %p55_p0  ;;  %p1174_p5 = scmp.ge.s32.totalorder %s1659_s20, 1 }
   0xc   : > { %p1746_p6 = por %p148_p3, %p55_p0  ;;  %p155_p7 = scmp.lt.s32.totalorder %s1659_s20, 3 }
   0xd   : > { %s1991_s25 = scalar_select %p1741_p4, 1, 0 }
   0xe   : > { %s1992_s26 = scalar_select %p1746_p6, 1, 0 }
   0xf   : > { %p1751_p8 = pnand %p1174_p5, %p155_p7  ;;  %s1661_s28 = smov [#allocation6]  }
  0x10   : > { %s167_s29 = sshll.u32 %s1661_s28, 4  ;;  %s1662_s5 = smov [#allocation8]   ;;  %s168_s29 = int_to_ptr.vmem [resolvable:$true] %s167_s29 }
  0x11   : > { %p1353_p9 = pneg %p1751_p8  ;;  %s180_s6 = sshll.u32 %s1662_s5, 4  ;;  %s181_s6 = int_to_ptr.vmem [resolvable:$true] %s180_s6 }
  0x12   : > { %s1506_s7 = scalar_lea.vmem %s168_s29, 2048  ;;  %p1514_p5 = scmp.lt.s32.totalorder %s168_s29, %s168_s29 }
  0x13   : > { %p1760_p11 = pnand %p1353_p9, %p1731_p1  ;;  %p1507_p13 = scmp.ne.s32.totalorder %s168_s29, %s1506_s7 }
  0x14   : > { %p1515_p7 = scmp.lt.s32.totalorder %s1506_s7, %s1506_s7 }
  0x15   : > { %p1497_p12 = pneg %p1760_p11 }
  0x16   : > { %p1516_p10 = por %p1515_p7, %p1514_p5 }
  0x17   : > { %p1509_p0 = pnand %p1507_p13, %p1497_p12 }
  0x19   : > { %p1510_p3 = pneg %p1509_p0 }
  0x1b   : > { %p1517_p9 = pnand %p1516_p10, %p1510_p3 }
  0x1d   : > { %1520 = shalt.err (!%p1517_p9)
}
  0x1e   : > { %s1663_s8 = smov 64   ;;  %s1664_s9 = smov 4  }
  0x1f   : > { %1356 = dma.hbm_to_vmem [thread:$0]  (!%p1760_p11), %s1980_s1, 2048, %s168_s29, [#allocation7], %s1663_s8, %s1663_s8, %s1664_s9  }
  0x20   : > { %s1532_s12 = scalar_lea.vmem %s181_s6, 2048  ;;  %p1540_p1 = scmp.lt.s32.totalorder %s181_s6, %s181_s6 }
  0x21   : > { %p1533_p6 = scmp.ne.s32.totalorder %s181_s6, %s1532_s12  ;;  %p1541_p4 = scmp.lt.s32.totalorder %s1532_s12, %s1532_s12 }
  0x23   : > { %p1535_p13 = pnand %p1533_p6, %p1497_p12  ;;  %p1542_p5 = por %p1541_p4, %p1540_p1 }
  0x25   : > { %p1536_p0 = pneg %p1535_p13 }
  0x27   : > { %p1543_p10 = pnand %p1542_p5, %p1536_p0 }
  0x29   : > { %1546 = shalt.err (!%p1543_p10)
}
  0x2a   : > { %s1987_s13 = smov 128   ;;  %s1988_s14 = smov 8  }
  0x2b   : > { %1359 = dma.hbm_to_vmem [thread:$0]  (!%p1760_p11), %s1981_s2, 2048, %s181_s6, [#allocation7], %s1987_s13, %s1987_s13, %s1988_s14  }
  0x2c   : > { %s33_s28 = sadd.s32 1, %s1655_s19  ;;  %s42_s29 = sadd.s32 1, %s1647_s17 }
  0x2d   : > { %p35_p1 = scmp.ge.s32.totalorder %s33_s28, 2  ;;  %p49_p4 = scmp.ne.s32.totalorder %s1647_s17, %s1643_s16 }
  0x2e   : > { %p50_p6 = scmp.eq.s32.totalorder %s1659_s20, 0  ;;  %p1370_p12 = scmp.lt.s32.totalorder %s1659_s20, 2 }
  0x2f   : > { %s2009_s28 = smov (%p35_p1, %s33_s28), 0  ;;  %p1795_p7 = por %p1735_p2, %p49_p4 }
  0x30   : > { %p51_p3 = por %p50_p6, %p49_p4  ;;  %s37_s5 = ssub.s32 %s1655_s19, %s2009_s28 }
  0x31   : > { %s197_s7 = sand.u32 1, %s1647_s17   ;;  %p40_p9 = scmp.eq.s32.totalorder %s37_s5, 0 }
  0x32   : > { %s1178_s6 = sshll.u32 %s197_s7, 7  ;;  %s1258_s8 = sshll.u32 %s1655_s19, 11 }
  0x33   : > { %s1804_s9 = scalar_select %p40_p9, %s1647_s17, %s42_s29  }
  0x34   : > { %s210_s12 = scalar_lea.hbm %s1979_s0, %s1258_s8  ;;  %s201_s21 = scalar_lea.vmem [#allocation3], %s1178_s6 }
  0x35   : > { %s211_s22 = sshll.u32 %s201_s21, 4  ;;  %p1811_p11 = pnand %p1370_p12, %p51_p3  ;;  %s212_s22 = int_to_ptr.vmem [resolvable:$true] %s211_s22 }
  0x36   : > { %s198_s13 = scalar_lea.sflag [#allocation4], %s197_s7  ;;  %s1560_s5 = scalar_lea.vmem %s212_s22, 2048 }
  0x37   : > { %p1549_p2 = pneg %p1811_p11  ;;  %p1561_p13 = scmp.ne.s32.totalorder %s212_s22, %s1560_s5 }
  0x38   : > { %s1667_s29 = smov [#allocation3]  }
  0x39   : > { %p1563_p0 = pnand %p1561_p13, %p1549_p2  ;;  %s1565_s14 = sshll.u32 %s1667_s29, 4  ;;  %s1566_s14 = int_to_ptr.vmem [resolvable:$false] %s1565_s14 }
  0x3a   : > { %s1567_s8 = scalar_lea.vmem %s1566_s14, 4096  ;;  %p1568_p10 = scmp.lt.s32.totalorder %s212_s22, %s1566_s14 }
  0x3b   : > { %p1564_p5 = pneg %p1563_p0  ;;  %p1569_p1 = scmp.lt.s32.totalorder %s1567_s8, %s1560_s5 }
  0x3d   : > { %p1570_p4 = por %p1569_p1, %p1568_p10 }
  0x3f   : > { %p1571_p6 = pnand %p1570_p4, %p1564_p5 }
  0x41   : > { %1574 = shalt.err (!%p1571_p6)
}
  0x42   : > { %s1997_s6 = smov 8   ;;  %s1998_s10 = smov 128  }
  0x43   : > { %1363 = dma.hbm_to_vmem [thread:$0]  (!%p1811_p11), %s210_s12, 2048, %s212_s22, %s198_s13, %s1998_s10, %s1998_s10, %s1997_s6  }
  0x44   : > { %223 = sbr.rel (%p1751_p8) target bundleno = 588 (0x24c), region = 36  ;;  %s1825_s7 = sand.u32 (!%p1751_p8), 1, %s1643_s16  }
  0x45   : > { %s1183_s14 = sshll.u32 (!%p1751_p8), %s1825_s7, 7  ;;  %s226_s11 = scalar_lea.sflag (!%p1751_p8), [#allocation4], %s1825_s7 }
  0x46   : > { %s1831_s21 = scalar_lea.vmem (!%p1751_p8), [#allocation3], %s1183_s14  ;;  %p1999_p12 = scmp.ne.s32.totalorder (!%p1751_p8), %s1991_s25, 0 }
  0x49   : > { %1626 = dma.done.wait (%p1999_p12), %s226_s11, 2048  }
  0x4a   : > { %1628 = vsyncadd (%p1999_p12), %s226_s11, 4294965248  ;;  %p2000_p3 = scmp.ne.s32.totalorder %s1989_s23, 0 }
  0x4c   : > { %1630 = dma.done.wait (%p2000_p3), [#allocation7], 4096  }
  0x4d   : > { %1632 = vsyncadd (%p2000_p3), [#allocation7], 4294963200  ;;  %v1431_v0 = vld [vmem:[#allocation6 + $0x78] sm:$0xff]   ;;  %v1433_v2 = vld [vmem:[#allocation6 + $0x70] sm:$0xff]   ;;  %v1668_v48 = vmov 0   ;;  %s1878_s27 = scalar_lea.vmem [#allocation9], %s1183_s14 }
  0x4e   : > { %v1432_v1 = vld [vmem:[#allocation6 + $0x38] sm:$0xff]   ;;  %1277 = vmatprep.subr.bf16.mxu0 %v1431_v0  ;;  %v1434_v3 = vld [vmem:[#allocation6 + $0x30] sm:$0xff]   ;;  %v1435_v4 = vld [vmem:[#allocation6 + $0x68] sm:$0xff]   ;;  %827 = vmatprep.mubr.bf16.mxu1 %v1668_v48  ;;  %s1276_s13 = sshll.u32 %s1651_s18, 11  ;;  %s1067_s12 = sshll.u32 %s1878_s27, 4  ;;  %s1930_s12 = int_to_ptr.vmem [resolvable:$true] %s1067_s12 }
  0x4f   : > { %1278 = vmatpush3.bf16.msra.mxu0 %v1432_v1  ;;  %v1436_v5 = vld [vmem:[#allocation6 + $0x28] sm:$0xff]   ;;  %v1437_v6 = vld [vmem:[#allocation6 + $0x60] sm:$0xff]   ;;  %v1439_v8 = vld [vmem:[#allocation6 + $0x58] sm:$0xff]   ;;  %s1928_s5 = scalar_lea.hbm %s1983_s4, %s1276_s13  ;;  %s1053_s29 = scalar_lea.sflag [#allocation5], %s1825_s7 }
  0x50   : > { %1279 = vmatprep.subr.bf16.mxu0 %v1433_v2  ;;  %v1438_v7 = vld [vmem:[#allocation6 + $0x20] sm:$0xff]   ;;  %v1440_v9 = vld [vmem:[#allocation6 + $0x18] sm:$0xff]   ;;  %v1441_v10 = vld [vmem:[#allocation6 + $0x50] sm:$0xff]   ;;  %s1575_s8 = scalar_lea.vmem %s1930_s12, 2048  ;;  %s1669_s18 = smov [#allocation9]  }
  0x51   : > { %v1449_v11 = vld [vmem:[%s1831_s21 + $0x4] ss:$8 sps:$4 sm:$0xff]   ;;  %v1442_v12 = vld [vmem:[#allocation6 + $0x10] sm:$0xff]   ;;  %v1447_v20 = vld [vmem:[%s1831_s21] ss:$8 sps:$4 sm:$0xff]   ;;  %p1576_p8 = scmp.ne.s32.totalorder %s1930_s12, %s1575_s8  ;;  %s1579_s6 = sshll.u32 %s1669_s18, 4  ;;  %s1580_s6 = int_to_ptr.vmem [resolvable:$false] %s1579_s6 }
  0x52   : > { %563 = vmatprep.mubr.bf16.mxu0 %v1449_v11  ;;  %v1443_v13 = vld [vmem:[#allocation6 + $0x48] sm:$0xff]   ;;  %v1445_v15 = vld [vmem:[#allocation6 + $0x40] sm:$0xff]   ;;  %v1471_v17 = vld [vmem:[#allocation8 + $0x74] ss:$8 sps:$4 sm:$0xff]   ;;  %s1581_s10 = scalar_lea.vmem %s1580_s6, 4096  ;;  %p1582_p2 = scmp.lt.s32.totalorder %s1930_s12, %s1580_s6 }
  0x53   : > { %1280 = vmatpush3.bf16.msra.mxu0 %v1434_v3  ;;  %v1444_v14 = vld [vmem:[#allocation6 + $0x8] sm:$0xff]   ;;  %v1446_v16 = vld [vmem:[#allocation6] sm:$0xff]   ;;  %v1473_v18 = vld [vmem:[#allocation8 + $0x70] ss:$8 sps:$4 sm:$0xff]   ;;  %795 = vmatprep.subr.bf16.mxu1 %v1471_v17  ;;  %p1577_p9 = pnand %p1576_p8, %p1795_p7  ;;  %p1583_p13 = scmp.lt.s32.totalorder %s1581_s10, %s1575_s8 }
  0x54   : > { %1281 = vmatprep.subr.bf16.mxu0 %v1435_v4  ;;  %v1474_v19 = vld [vmem:[#allocation8 + $0x64] ss:$8 sps:$4 sm:$0xff]   ;;  %796 = vmatpush1.bf16.msra.mxu1 %v1473_v18  ;;  %v1476_v21 = vld [vmem:[#allocation8 + $0x60] ss:$8 sps:$4 sm:$0xff]   ;;  %v1450_v22 = vld [vmem:[%s1831_s21 + $0x14] ss:$8 sps:$4 sm:$0xff]  }
  0x55   : > { %797 = vmatprep.subr.bf16.mxu1 %v1474_v19  ;;  %v1477_v23 = vld [vmem:[#allocation8 + $0x54] ss:$8 sps:$4 sm:$0xff]   ;;  %v1479_v24 = vld [vmem:[#allocation8 + $0x50] ss:$8 sps:$4 sm:$0xff]   ;;  %v1480_v25 = vld [vmem:[#allocation8 + $0x44] ss:$8 sps:$4 sm:$0xff]   ;;  %p1578_p11 = pneg %p1577_p9  ;;  %p1584_p0 = por %p1583_p13, %p1582_p2 }
  0x56   : > { %v1452_v26 = vld [vmem:[%s1831_s21 + $0x10] ss:$8 sps:$4 sm:$0xff]   ;;  %v1482_v27 = vld [vmem:[#allocation8 + $0x40] ss:$8 sps:$4 sm:$0xff]   ;;  %v1453_v28 = vld [vmem:[%s1831_s21 + $0x24] ss:$8 sps:$4 sm:$0xff]  }
  0x57   : > { %1282 = vmatpush3.bf16.msra.mxu0 %v1436_v5  ;;  %v1483_v29 = vld [vmem:[#allocation8 + $0x34] ss:$8 sps:$4 sm:$0xff]   ;;  %v1485_v30 = vld [vmem:[#allocation8 + $0x30] ss:$8 sps:$4 sm:$0xff]   ;;  %v1486_v31 = vld [vmem:[#allocation8 + $0x24] ss:$8 sps:$4 sm:$0xff]   ;;  %p1585_p5 = pnand %p1584_p0, %p1578_p11 }
  0x58   : > { %1283 = vmatprep.subr.bf16.mxu0 %v1437_v6  ;;  %798 = vmatpush1.bf16.msra.mxu1 %v1476_v21  ;;  %v1455_v32 = vld [vmem:[%s1831_s21 + $0x20] ss:$8 sps:$4 sm:$0xff]   ;;  %v1456_v33 = vld [vmem:[%s1831_s21 + $0x34] ss:$8 sps:$4 sm:$0xff]   ;;  %v1458_v34 = vld [vmem:[%s1831_s21 + $0x30] ss:$8 sps:$4 sm:$0xff]  }
  0x59   : > { %799 = vmatprep.subr.bf16.mxu1 %v1477_v23  ;;  %v1459_v35 = vld [vmem:[%s1831_s21 + $0x44] ss:$8 sps:$4 sm:$0xff]   ;;  %v1461_v36 = vld [vmem:[%s1831_s21 + $0x40] ss:$8 sps:$4 sm:$0xff]   ;;  %v1462_v37 = vld [vmem:[%s1831_s21 + $0x54] ss:$8 sps:$4 sm:$0xff]  }
  0x5a   : > { %v1464_v38 = vld [vmem:[%s1831_s21 + $0x50] ss:$8 sps:$4 sm:$0xff]   ;;  %v1465_v39 = vld [vmem:[%s1831_s21 + $0x64] ss:$8 sps:$4 sm:$0xff]   ;;  %v1467_v40 = vld [vmem:[%s1831_s21 + $0x60] ss:$8 sps:$4 sm:$0xff]  }
  0x5b   : > { %1284 = vmatpush3.bf16.msra.mxu0 %v1438_v7  ;;  %v1468_v41 = vld [vmem:[%s1831_s21 + $0x74] ss:$8 sps:$4 sm:$0xff]   ;;  %v1470_v42 = vld [vmem:[%s1831_s21 + $0x70] ss:$8 sps:$4 sm:$0xff]   ;;  %v1488_v43 = vld [vmem:[#allocation8 + $0x20] ss:$8 sps:$4 sm:$0xff]  }
  0x5c   : > { %1285 = vmatprep.subr.bf16.mxu0 %v1439_v8  ;;  %800 = vmatpush1.bf16.msra.mxu1 %v1479_v24  ;;  %v1489_v44 = vld [vmem:[#allocation8 + $0x14] ss:$8 sps:$4 sm:$0xff]   ;;  %v1491_v45 = vld [vmem:[#allocation8 + $0x10] ss:$8 sps:$4 sm:$0xff]   ;;  %v1492_v46 = vld [vmem:[#allocation8 + $0x4] ss:$8 sps:$4 sm:$0xff]  }
  0x5d   : > { %801 = vmatprep.subr.bf16.mxu1 %v1480_v25  ;;  %v1494_v47 = vld [vmem:[#allocation8] ss:$8 sps:$4 sm:$0xff]  }
  0x5f   : > { %1286 = vmatpush3.bf16.msra.mxu0 %v1440_v9 }
  0x60   : > { %1287 = vmatprep.subr.bf16.mxu0 %v1441_v10  ;;  %802 = vmatpush1.bf16.msra.mxu1 %v1482_v27 }
  0x61   : > { %803 = vmatprep.subr.bf16.mxu1 %v1483_v29 }
  0x63   : > { %1288 = vmatpush3.bf16.msra.mxu0 %v1442_v12 }
  0x64   : > { %1289 = vmatprep.subr.bf16.mxu0 %v1443_v13  ;;  %804 = vmatpush1.bf16.msra.mxu1 %v1485_v30 }
  0x65   : > { %805 = vmatprep.subr.bf16.mxu1 %v1486_v31 }
  0x67   : > { %1290 = vmatpush3.bf16.msra.mxu0 %v1444_v14 }
  0x68   : > { %1291 = vmatprep.subr.bf16.mxu0 %v1445_v15  ;;  %806 = vmatpush1.bf16.msra.mxu1 %v1488_v43 }
  0x69   : > { %807 = vmatprep.subr.bf16.mxu1 %v1489_v44  ;;  %v703_v44 = vld [vmem:[%s1982_s3] sm:$0x3] }
  0x6b   : > { %1292 = vmatpush3.bf16.msra.mxu0 %v1446_v16 }
  0x6c   : > { %808 = vmatpush1.bf16.msra.mxu1 %v1491_v45 }
  0x6d   : > { %809 = vmatprep.subr.bf16.mxu1 %v1492_v46 }
  0x6e   : > { %564 = vmatmul.mubr.bf16.vlgmr.msra.gmra.mxu0 %v1447_v20 }
  0x6f   : > { %571 = vmatprep.mubr.bf16.mxu0 %v1450_v22 }
  0x70   : > { %810 = vmatpush1.bf16.msra.mxu1 %v1494_v47 }
  0x76   : > { %572 = vmatmul.mubr.bf16.gmra.mxu0 %v1452_v26 }
  0x77   : > { %579 = vmatprep.mubr.bf16.mxu0 %v1453_v28 }
  0x7e   : > { %580 = vmatmul.mubr.bf16.gmra.mxu0 %v1455_v32 }
  0x7f   : > { %587 = vmatprep.mubr.bf16.mxu0 %v1456_v33 }
  0x86   : > { %588 = vmatmul.mubr.bf16.gmra.mxu0 %v1458_v34 }
  0x87   : > { %595 = vmatprep.mubr.bf16.mxu0 %v1459_v35 }
  0x8e   : > { %596 = vmatmul.mubr.bf16.gmra.mxu0 %v1461_v36 }
  0x8f   : > { %603 = vmatprep.mubr.bf16.mxu0 %v1462_v37 }
  0x96   : > { %604 = vmatmul.mubr.bf16.gmra.mxu0 %v1464_v38 }
  0x97   : > { %611 = vmatprep.mubr.bf16.mxu0 %v1465_v39 }
  0x9e   : > { %612 = vmatmul.mubr.bf16.gmra.mxu0 %v1467_v40 }
  0x9f   : > { %619 = vmatprep.mubr.bf16.mxu0 %v1468_v41  ;;  %v705_v41 = vlaneseq }
  0xa6   : > { %620 = vmatmul.mubr.bf16.gmra.mxu0 %v1470_v42  ;;  %v706_v42 = vshrl.u32 %v705_v41, 7 }
  0xa8   : > { %v707_v43 = vsub.s32 0, %v706_v42  ;;  %v711_v45 = vsub.s32 1, %v706_v42 }
  0xaa   : > { %v1868_v46 = vrot.slane %v703_v44, %v707_v43  ;;  %v1870_v47 = vrot.slane %v703_v44, %v711_v45 }
 0x12e   : > { %v1293_v49 = vpop.f32.mrf.mxu0 }
 0x130   : > { %v1294_v50 = vpop.f32.mrf.mxu0 }
 0x131   : > { %v1295_v53 = vadd.f32 %v1294_v50, %v1293_v49 }
 0x132   : > { %v1296_v51 = vpop.f32.mrf.mxu0 }
 0x134   : > { %v1297_v52 = vpop.f32.mrf.mxu0 }
 0x135   : > { %v1298_v54 = vadd.f32 %v1297_v52, %v1296_v51 }
 0x136   : > { %v1299_v55 = vpop.f32.mrf.mxu0 }
 0x137   : > { %v679_v56 = vpack.c.bf16 %v1298_v54, %v1295_v53 }
 0x138   : > { %v1300_v57 = vpop.f32.mrf.mxu0 }
 0x139   : > { %828 = vmatmul.mubr.bf16.vlgmr.msra.gmra.mxu1 %v679_v56  ;;  %v1301_v60 = vadd.f32 %v1300_v57, %v1299_v55 }
 0x13a   : > { %v1302_v58 = vpop.f32.mrf.mxu0  ;;  %837 = vmatprep.mubr.bf16.mxu1 %v1668_v48 }
 0x13c   : > { %v1303_v59 = vpop.f32.mrf.mxu0 }
 0x13d   : > { %v1304_v61 = vadd.f32 %v1303_v59, %v1302_v58 }
 0x13e   : > { %v1305_v62 = vpop.f32.mrf.mxu0 }
 0x13f   : > { %v680_v63 = vpack.c.bf16 %v1304_v61, %v1301_v60 }
 0x140   : > { %v1306_v0 = vpop.f32.mrf.mxu0 }
 0x141   : > { %838 = vmatmul.mubr.bf16.gmra.mxu1 %v680_v63  ;;  %v1307_v3 = vadd.f32 %v1306_v0, %v1305_v62 }
 0x142   : > { %v1308_v1 = vpop.f32.mrf.mxu0  ;;  %847 = vmatprep.mubr.bf16.mxu1 %v1668_v48 }
 0x144   : > { %v1309_v2 = vpop.f32.mrf.mxu0 }
 0x145   : > { %v1310_v4 = vadd.f32 %v1309_v2, %v1308_v1 }
 0x146   : > { %v1311_v5 = vpop.f32.mrf.mxu0 }
 0x147   : > { %v681_v6 = vpack.c.bf16 %v1310_v4, %v1307_v3 }
 0x148   : > { %v1312_v7 = vpop.f32.mrf.mxu0 }
 0x149   : > { %848 = vmatmul.mubr.bf16.gmra.mxu1 %v681_v6  ;;  %v1313_v10 = vadd.f32 %v1312_v7, %v1311_v5 }
 0x14a   : > { %v1314_v8 = vpop.f32.mrf.mxu0  ;;  %857 = vmatprep.mubr.bf16.mxu1 %v1668_v48 }
 0x14c   : > { %v1315_v9 = vpop.f32.mrf.mxu0 }
 0x14d   : > { %v1316_v11 = vadd.f32 %v1315_v9, %v1314_v8 }
 0x14e   : > { %v1317_v12 = vpop.f32.mrf.mxu0 }
 0x14f   : > { %v682_v13 = vpack.c.bf16 %v1316_v11, %v1313_v10 }
 0x150   : > { %v1318_v14 = vpop.f32.mrf.mxu0 }
 0x151   : > { %858 = vmatmul.mubr.bf16.gmra.mxu1 %v682_v13  ;;  %v1319_v17 = vadd.f32 %v1318_v14, %v1317_v12 }
 0x152   : > { %v1320_v15 = vpop.f32.mrf.mxu0  ;;  %867 = vmatprep.mubr.bf16.mxu1 %v1668_v48 }
 0x154   : > { %v1321_v16 = vpop.f32.mrf.mxu0 }
 0x155   : > { %v1322_v18 = vadd.f32 %v1321_v16, %v1320_v15 }
 0x156   : > { %v1323_v19 = vpop.f32.mrf.mxu0 }
 0x157   : > { %v683_v20 = vpack.c.bf16 %v1322_v18, %v1319_v17 }
 0x158   : > { %v1324_v21 = vpop.f32.mrf.mxu0 }
 0x159   : > { %868 = vmatmul.mubr.bf16.gmra.mxu1 %v683_v20  ;;  %v1325_v24 = vadd.f32 %v1324_v21, %v1323_v19 }
 0x15a   : > { %v1326_v22 = vpop.f32.mrf.mxu0  ;;  %877 = vmatprep.mubr.bf16.mxu1 %v1668_v48 }
 0x15c   : > { %v1327_v23 = vpop.f32.mrf.mxu0 }
 0x15d   : > { %v1328_v25 = vadd.f32 %v1327_v23, %v1326_v22 }
 0x15e   : > { %v1329_v26 = vpop.f32.mrf.mxu0 }
 0x15f   : > { %v684_v27 = vpack.c.bf16 %v1328_v25, %v1325_v24 }
 0x160   : > { %v1330_v28 = vpop.f32.mrf.mxu0 }
 0x161   : > { %878 = vmatmul.mubr.bf16.gmra.mxu1 %v684_v27  ;;  %v1331_v31 = vadd.f32 %v1330_v28, %v1329_v26 }
 0x162   : > { %v1332_v29 = vpop.f32.mrf.mxu0  ;;  %887 = vmatprep.mubr.bf16.mxu1 %v1668_v48 }
 0x164   : > { %v1333_v30 = vpop.f32.mrf.mxu0 }
 0x165   : > { %v1334_v32 = vadd.f32 %v1333_v30, %v1332_v29 }
 0x166   : > { %v1335_v33 = vpop.f32.mrf.mxu0 }
 0x167   : > { %v685_v34 = vpack.c.bf16 %v1334_v32, %v1331_v31 }
 0x168   : > { %v1336_v35 = vpop.f32.mrf.mxu0 }
 0x169   : > { %888 = vmatmul.mubr.bf16.gmra.mxu1 %v685_v34  ;;  %v1337_v38 = vadd.f32 %v1336_v35, %v1335_v33 }
 0x16a   : > { %v1338_v36 = vpop.f32.mrf.mxu0  ;;  %897 = vmatprep.mubr.bf16.mxu1 %v1668_v48 }
 0x16c   : > { %v1339_v37 = vpop.f32.mrf.mxu0 }
 0x16d   : > { %v1340_v39 = vadd.f32 %v1339_v37, %v1338_v36 }
 0x16f   : > { %v686_v40 = vpack.c.bf16 %v1340_v39, %v1337_v38 }
 0x171   : > { %898 = vmatmul.mubr.bf16.gmra.mxu1 %v686_v40 }
 0x1f9   : > { %v829_v49 = vpop.f32.mrf.mxu1 }
 0x1fa   : > { %v830_v48 = vadd.f32 %v829_v49, %v1868_v46 }
 0x1fb   : > { %v831_v50 = vpop.f32.mrf.mxu1 }
 0x1fc   : > { %v832_v51 = vadd.f32 %v831_v50, %v1870_v47  ;;  %v908_v53 = vmax.f32 %v830_v48, 0.0 }
 0x1fd   : > { %v833_v52 = vpop.f32.mrf.mxu1 }
 0x1fe   : > { %v909_v54 = vmax.f32 %v832_v51, 0.0  ;;  %v834_v55 = vadd.f32 %v833_v52, %v1868_v46 }
 0x1ff   : > { %v835_v56 = vpop.f32.mrf.mxu1 }
 0x200   : > { %v1259_v57 = vpack.c.bf16 %v909_v54, %v908_v53  ;;  %v836_v58 = vadd.f32 %v835_v56, %v1870_v47  ;;  %v910_v60 = vmax.f32 %v834_v55, 0.0 }
 0x201   : > { %v839_v59 = vpop.f32.mrf.mxu1 }
 0x202   : > { %1036 = vst [vmem:[%s1878_s27] sm:$0xff] %v1259_v57  ;;  %v911_v61 = vmax.f32 %v836_v58, 0.0  ;;  %v840_v62 = vadd.f32 %v839_v59, %v1868_v46 }
 0x203   : > { %v841_v63 = vpop.f32.mrf.mxu1 }
 0x204   : > { %v1260_v0 = vpack.c.bf16 %v911_v61, %v910_v60  ;;  %v842_v1 = vadd.f32 %v841_v63, %v1870_v47  ;;  %v912_v3 = vmax.f32 %v840_v62, 0.0 }
 0x205   : > { %v843_v2 = vpop.f32.mrf.mxu1 }
 0x206   : > { %1037 = vst [vmem:[%s1878_s27 + $0x8] sm:$0xff] %v1260_v0  ;;  %v913_v4 = vmax.f32 %v842_v1, 0.0  ;;  %v844_v5 = vadd.f32 %v843_v2, %v1868_v46 }
 0x207   : > { %v845_v6 = vpop.f32.mrf.mxu1 }
 0x208   : > { %v1261_v7 = vpack.c.bf16 %v913_v4, %v912_v3  ;;  %v846_v8 = vadd.f32 %v845_v6, %v1870_v47  ;;  %v914_v10 = vmax.f32 %v844_v5, 0.0 }
 0x209   : > { %v849_v9 = vpop.f32.mrf.mxu1 }
 0x20a   : > { %1038 = vst [vmem:[%s1878_s27 + $0x10] sm:$0xff] %v1261_v7  ;;  %v915_v11 = vmax.f32 %v846_v8, 0.0  ;;  %v850_v12 = vadd.f32 %v849_v9, %v1868_v46 }
 0x20b   : > { %v851_v13 = vpop.f32.mrf.mxu1 }
 0x20c   : > { %v1262_v14 = vpack.c.bf16 %v915_v11, %v914_v10  ;;  %v852_v15 = vadd.f32 %v851_v13, %v1870_v47  ;;  %v916_v17 = vmax.f32 %v850_v12, 0.0 }
 0x20d   : > { %v853_v16 = vpop.f32.mrf.mxu1 }
 0x20e   : > { %1039 = vst [vmem:[%s1878_s27 + $0x18] sm:$0xff] %v1262_v14  ;;  %v917_v18 = vmax.f32 %v852_v15, 0.0  ;;  %v854_v19 = vadd.f32 %v853_v16, %v1868_v46 }
 0x20f   : > { %v855_v20 = vpop.f32.mrf.mxu1 }
 0x210   : > { %v1263_v21 = vpack.c.bf16 %v917_v18, %v916_v17  ;;  %v856_v22 = vadd.f32 %v855_v20, %v1870_v47  ;;  %v918_v24 = vmax.f32 %v854_v19, 0.0 }
 0x211   : > { %v859_v23 = vpop.f32.mrf.mxu1 }
 0x212   : > { %1040 = vst [vmem:[%s1878_s27 + $0x20] sm:$0xff] %v1263_v21  ;;  %v919_v25 = vmax.f32 %v856_v22, 0.0  ;;  %v860_v26 = vadd.f32 %v859_v23, %v1868_v46 }
 0x213   : > { %v861_v27 = vpop.f32.mrf.mxu1 }
 0x214   : > { %v1264_v28 = vpack.c.bf16 %v919_v25, %v918_v24  ;;  %v862_v29 = vadd.f32 %v861_v27, %v1870_v47  ;;  %v920_v31 = vmax.f32 %v860_v26, 0.0 }
 0x215   : > { %v863_v30 = vpop.f32.mrf.mxu1 }
 0x216   : > { %1041 = vst [vmem:[%s1878_s27 + $0x28] sm:$0xff] %v1264_v28  ;;  %v921_v32 = vmax.f32 %v862_v29, 0.0  ;;  %v864_v33 = vadd.f32 %v863_v30, %v1868_v46 }
 0x217   : > { %v865_v34 = vpop.f32.mrf.mxu1 }
 0x218   : > { %v1265_v35 = vpack.c.bf16 %v921_v32, %v920_v31  ;;  %v866_v36 = vadd.f32 %v865_v34, %v1870_v47  ;;  %v922_v38 = vmax.f32 %v864_v33, 0.0 }
 0x219   : > { %v869_v37 = vpop.f32.mrf.mxu1 }
 0x21a   : > { %1042 = vst [vmem:[%s1878_s27 + $0x30] sm:$0xff] %v1265_v35  ;;  %v923_v39 = vmax.f32 %v866_v36, 0.0  ;;  %v870_v40 = vadd.f32 %v869_v37, %v1868_v46 }
 0x21b   : > { %v871_v41 = vpop.f32.mrf.mxu1 }
 0x21c   : > { %v1266_v42 = vpack.c.bf16 %v923_v39, %v922_v38  ;;  %v872_v43 = vadd.f32 %v871_v41, %v1870_v47  ;;  %v924_v45 = vmax.f32 %v870_v40, 0.0 }
 0x21d   : > { %v873_v44 = vpop.f32.mrf.mxu1 }
 0x21e   : > { %1043 = vst [vmem:[%s1878_s27 + $0x38] sm:$0xff] %v1266_v42  ;;  %v925_v49 = vmax.f32 %v872_v43, 0.0  ;;  %v874_v48 = vadd.f32 %v873_v44, %v1868_v46 }
 0x21f   : > { %v875_v50 = vpop.f32.mrf.mxu1 }
 0x220   : > { %v1267_v51 = vpack.c.bf16 %v925_v49, %v924_v45  ;;  %v876_v52 = vadd.f32 %v875_v50, %v1870_v47  ;;  %v926_v54 = vmax.f32 %v874_v48, 0.0 }
 0x221   : > { %v879_v53 = vpop.f32.mrf.mxu1 }
 0x222   : > { %1044 = vst [vmem:[%s1878_s27 + $0x40] sm:$0xff] %v1267_v51  ;;  %v927_v55 = vmax.f32 %v876_v52, 0.0  ;;  %v880_v56 = vadd.f32 %v879_v53, %v1868_v46 }
 0x223   : > { %v881_v57 = vpop.f32.mrf.mxu1 }
 0x224   : > { %v1268_v58 = vpack.c.bf16 %v927_v55, %v926_v54  ;;  %v882_v59 = vadd.f32 %v881_v57, %v1870_v47  ;;  %v928_v61 = vmax.f32 %v880_v56, 0.0 }
 0x225   : > { %v883_v60 = vpop.f32.mrf.mxu1 }
 0x226   : > { %1045 = vst [vmem:[%s1878_s27 + $0x48] sm:$0xff] %v1268_v58  ;;  %v929_v62 = vmax.f32 %v882_v59, 0.0  ;;  %v884_v63 = vadd.f32 %v883_v60, %v1868_v46 }
 0x227   : > { %v885_v0 = vpop.f32.mrf.mxu1 }
 0x228   : > { %v1269_v1 = vpack.c.bf16 %v929_v62, %v928_v61  ;;  %v886_v2 = vadd.f32 %v885_v0, %v1870_v47  ;;  %v930_v4 = vmax.f32 %v884_v63, 0.0 }
 0x229   : > { %v889_v3 = vpop.f32.mrf.mxu1 }
 0x22a   : > { %1046 = vst [vmem:[%s1878_s27 + $0x50] sm:$0xff] %v1269_v1  ;;  %v931_v5 = vmax.f32 %v886_v2, 0.0  ;;  %v890_v6 = vadd.f32 %v889_v3, %v1868_v46 }
 0x22b   : > { %v891_v7 = vpop.f32.mrf.mxu1 }
 0x22c   : > { %v1270_v8 = vpack.c.bf16 %v931_v5, %v930_v4  ;;  %v892_v9 = vadd.f32 %v891_v7, %v1870_v47  ;;  %v932_v11 = vmax.f32 %v890_v6, 0.0 }
 0x22d   : > { %v893_v10 = vpop.f32.mrf.mxu1 }
 0x22e   : > { %1047 = vst [vmem:[%s1878_s27 + $0x58] sm:$0xff] %v1270_v8  ;;  %v933_v12 = vmax.f32 %v892_v9, 0.0  ;;  %v894_v13 = vadd.f32 %v893_v10, %v1868_v46 }
 0x22f   : > { %v895_v14 = vpop.f32.mrf.mxu1 }
 0x230   : > { %v1271_v15 = vpack.c.bf16 %v933_v12, %v932_v11  ;;  %v896_v16 = vadd.f32 %v895_v14, %v1870_v47  ;;  %v934_v18 = vmax.f32 %v894_v13, 0.0 }
 0x231   : > { %v899_v17 = vpop.f32.mrf.mxu1 }
 0x232   : > { %1048 = vst [vmem:[%s1878_s27 + $0x60] sm:$0xff] %v1271_v15  ;;  %v935_v19 = vmax.f32 %v896_v16, 0.0  ;;  %v900_v20 = vadd.f32 %v899_v17, %v1868_v46 }
 0x233   : > { %v901_v21 = vpop.f32.mrf.mxu1 }
 0x234   : > { %v1272_v22 = vpack.c.bf16 %v935_v19, %v934_v18  ;;  %v902_v23 = vadd.f32 %v901_v21, %v1870_v47  ;;  %v936_v25 = vmax.f32 %v900_v20, 0.0 }
 0x235   : > { %v903_v24 = vpop.f32.mrf.mxu1 }
 0x236   : > { %1049 = vst [vmem:[%s1878_s27 + $0x68] sm:$0xff] %v1272_v22  ;;  %v937_v26 = vmax.f32 %v902_v23, 0.0  ;;  %v904_v27 = vadd.f32 %v903_v24, %v1868_v46 }
 0x237   : > { %v905_v28 = vpop.f32.mrf.mxu1 }
 0x238   : > { %v1273_v29 = vpack.c.bf16 %v937_v26, %v936_v25  ;;  %v906_v30 = vadd.f32 %v905_v28, %v1870_v47  ;;  %v938_v31 = vmax.f32 %v904_v27, 0.0 }
 0x23a   : > { %1050 = vst [vmem:[%s1878_s27 + $0x70] sm:$0xff] %v1273_v29  ;;  %v939_v32 = vmax.f32 %v906_v30, 0.0 }
 0x23c   : > { %v1274_v46 = vpack.c.bf16 %v939_v32, %v938_v31 }
 0x23e   : > { %1051 = vst [vmem:[%s1878_s27 + $0x78] sm:$0xff] %v1274_v46 }
 0x23f   : > { %1588 = shalt.err (!%p1585_p5)
}
 0x240   : > { %s1589_s14 = scalar_lea.hbm %s1928_s5, 2048  ;;  %s1593_s23 = scalar_lea.hbm %s1983_s4, 4096 }
 0x241   : > { %p1590_p10 = scmp.ne.s32.totalorder %s1928_s5, %s1589_s14  ;;  %p1594_p6 = scmp.lt.s32.totalorder %s1928_s5, %s1983_s4 }
 0x242   : > { %p1595_p12 = scmp.lt.s32.totalorder %s1593_s23, %s1589_s14 }
 0x243   : > { %p1591_p1 = pnand %p1590_p10, %p1795_p7 }
 0x244   : > { %p1596_p3 = por %p1595_p12, %p1594_p6 }
 0x245   : > { %p1592_p4 = pneg %p1591_p1 }
 0x247   : > { %p1597_p8 = pnand %p1596_p3, %p1592_p4 }
 0x249   : > { %1600 = shalt.err (!%p1597_p8)
}
 0x24a   : > { %s1670_s13 = smov 128   ;;  %s1671_s22 = smov 8  }
 0x24b   : > { %1351 = dma.vmem_to_hbm [thread:$0]  (%p1795_p7), %s1930_s12, 2048, %s1928_s5, %s1053_s29, %s1670_s13, %s1670_s13, %s1671_s22  }
 0x24c PF: > { %s1082_s24 = sand.u32 1, %s1639_s15   ;;  %p2001_p9 = scmp.ne.s32.totalorder %s1992_s26, 0 }
 0x24d   : > { %p2002_p11 = scmp.ge.s32.totalorder %s1659_s20, 2  ;;  %s1083_s8 = scalar_lea.sflag [#allocation5], %s1082_s24 }
 0x24f   : > { %p1365_p2 = pnand %p2002_p11, %p2001_p9 }
 0x251   : > { %p1366_p13 = pneg %p1365_p2 }
 0x253   : > { %1634 = dma.done.wait (%p1366_p13), %s1083_s8, 2048  }
 0x254   : > { %1636 = vsyncadd (%p1366_p13), %s1083_s8, 4294965248  ;;  %s21_s20 = sadd.s32 1, %s1659_s20   ;;  %s2003_s15 = smov %s1643_s16 }
 0x255   : > { %p18_p0 = scmp.ge.s32.totalorder %s21_s20, 4   ;;  %s2004_s16 = smov %s1647_s17 }
 0x256   : > { %s2005_s17 = smov %s1804_s9  ;;  %s2006_s18 = smov %s1655_s19 }
 0x257   : > { %s2007_s19 = smov %s2009_s28  ;;  %20 = sbr.rel (!%p18_p0) target bundleno = 7 (0x7), region = 98 }
 0x25c   :  { %1088 = vsyncpa [#allocation4], 1 }
 0x25d   :  { %1090 = vsyncpa [#allocation4 + $0x1], 1 }
 0x25e   :  { %1091 = vsyncpa [#allocation7], 1 }
 0x25f   :  { %1092 = vsyncpa [#allocation5], 1 }
 0x260   :  { %1094 = vsyncpa [#allocation5 + $0x1], 1 }

</bundles_post_ra>
